<compile_context>
chip_gen: v7x
topology: tpu7x:2x2x1
jax: 0.10.0
libtpu: 0.0.40
codegen_flags: <defaults>
</compile_context>

<pallas_src>
import functools

import jax
import jax.numpy as jnp
from jax.experimental import pallas as pl
from jax.experimental.pallas import tpu as pltpu


def _round_up(x, m):
    return ((x + m - 1) // m) * m


def softmax_body_kernel(x_ref, g_ref, actions_ref, *, T):
    """x_ref: (A, TB) Q-values (actions on sublanes, batch on lanes);
    g_ref: (A, TB) f32 Gumbel(0,1) noise; actions_ref: (1, TB) int32."""
    A = x_ref.shape[0]

    # Gumbel-max sample == multinomial(softmax(T * logits)).
    z = x_ref[...].astype(jnp.float32) * T + g_ref[...]            # (A, TB)  VPU
    m = jnp.max(z, axis=0, keepdims=True)                          # (1, TB)  sublane reduce

    # argmax over the sublane (action) axis without an argmax primitive:
    # smallest action index whose value attains the per-column max.
    row = jax.lax.broadcasted_iota(jnp.int32, z.shape, 0)          # action index per sublane
    idx = jnp.min(jnp.where(z >= m, row, A), axis=0, keepdims=True)

    actions_ref[...] = idx.astype(jnp.int32)                       # lane-dense store


def softmax_body(outputs, *, T, key, block_b=1024):
    """outputs: (B, A) Q-values (any float dtype). Returns (B, 1) int32 sampled actions."""
    B, A = outputs.shape

    # Batch on the 128-lane axis, actions on the sublanes.
    x = outputs.T                                                  # (A, B), native dtype
    g = jax.random.gumbel(key, (A, B), dtype=jnp.float32)          # lane-dense noise

    # Tile the batch; pad to a multiple of the lane tile (multiple of 128).
    tb = min(block_b, _round_up(B, 128))
    bp = _round_up(B, tb)
    if bp != B:
        x = jnp.pad(x, ((0, 0), (0, bp - B)))
        g = jnp.pad(g, ((0, 0), (0, bp - B)))

    kernel = functools.partial(softmax_body_kernel, T=float(T))
    out = pl.pallas_call(
        kernel,
        out_shape=jax.ShapeDtypeStruct((1, bp), jnp.int32),
        grid=(bp // tb,),
        in_specs=[
            pl.BlockSpec((A, tb), lambda i: (0, i)),
            pl.BlockSpec((A, tb), lambda i: (0, i)),
        ],
        out_specs=pl.BlockSpec((1, tb), lambda i: (0, i)),
        compiler_params=pltpu.CompilerParams(
            dimension_semantics=("parallel",),   # batch tiles are independent (v7x: 2 TCs)
        ),
    )(x, g)

    # TODO(synk): PyTorch multinomial returns int64; TPU vectors are 32-bit, so int32 is emitted.
    return out[0, :B].reshape(B, 1)


if __name__ == "__main__":
    key = jax.random.PRNGKey(0)
    k_q, k_sample = jax.random.split(key)

    B, A = 4, 8                      # batch of 4 states, 8 possible Doom actions
    T = 7.0                          # temperature used when constructing SoftmaxBody(T)
    outputs = jax.random.normal(k_q, (B, A), dtype=jnp.float32)

    actions = softmax_body(outputs, T=T, key=k_sample)
    jax.block_until_ready(actions)

    assert actions.shape == (B, 1)
    assert actions.dtype == jnp.int32
    assert bool(jnp.all((actions >= 0) & (actions < A)))
    print("KERNEL_OK")
</pallas_src>

<mosaic_0001>
module attributes {stable_mosaic.version = 11 : i64} {
  func.func @softmax_body_kernel(%arg0: i32, %arg1: memref<8x128xf32, #tpu.memory_space<vmem>>, %arg2: memref<8x128xf32, #tpu.memory_space<vmem>>, %arg3: memref<1x128xi32, #tpu.memory_space<vmem>>) attributes {dimension_semantics = [#tpu.dimension_semantics<parallel>], iteration_bounds = array<i64: 1>, scalar_prefetch = 0 : i64, scratch_operands = 0 : i64, tpu.core_type = #tpu.core_type<tc>, window_params = [{transform_indices = @transform_0, window_bounds = array<i64: 8, 128>}, {transform_indices = @transform_1, window_bounds = array<i64: 8, 128>}, {transform_indices = @transform_2, window_bounds = array<i64: 1, 128>}]} {
    %c0 = arith.constant 0 : index
    %c0_0 = arith.constant 0 : index
    %0 = vector.load %arg1[%c0, %c0_0] : memref<8x128xf32, #tpu.memory_space<vmem>>, vector<8x128xf32>
    %cst = arith.constant 7.000000e+00 : f32
    %1 = vector.broadcast %cst : f32 to vector<8x128xf32>
    %2 = arith.mulf %0, %1 : vector<8x128xf32>
    %c0_1 = arith.constant 0 : index
    %c0_2 = arith.constant 0 : index
    %3 = vector.load %arg2[%c0_1, %c0_2] : memref<8x128xf32, #tpu.memory_space<vmem>>, vector<8x128xf32>
    %4 = arith.addf %2, %3 : vector<8x128xf32>
    %cst_3 = arith.constant dense<0xFF800000> : vector<128xf32>
    %5 = vector.multi_reduction <maximumf>, %4, %cst_3 [0] : vector<8x128xf32> to vector<128xf32>
    %6 = vector.shape_cast %5 : vector<128xf32> to vector<1x128xf32>
    %7 = tpu.iota {dimensions = array<i32: 0>} : vector<8x128xi32>
    %8 = vector.broadcast %6 : vector<1x128xf32> to vector<8x128xf32>
    %9 = arith.cmpf oge, %4, %8 : vector<8x128xf32>
    %c8_i32 = arith.constant 8 : i32
    %10 = vector.broadcast %c8_i32 : i32 to vector<8x128xi32>
    %11 = arith.select %9, %7, %10 : vector<8x128xi1>, vector<8x128xi32>
    %cst_4 = arith.constant dense<2147483647> : vector<128xi32>
    %12 = vector.multi_reduction <minsi>, %11, %cst_4 [0] : vector<8x128xi32> to vector<128xi32>
    %13 = vector.shape_cast %12 : vector<128xi32> to vector<1x128xi32>
    %c0_5 = arith.constant 0 : index
    %c0_6 = arith.constant 0 : index
    %14 = vector.load %arg3[%c0_5, %c0_6] : memref<1x128xi32, #tpu.memory_space<vmem>>, vector<1x128xi32>
    tpu.vector_store %arg3[%c0_5, %c0_6], %13 {strides = array<i32>} : memref<1x128xi32, #tpu.memory_space<vmem>>, vector<1x128xi32>,
    return
  }
  func.func @transform_0(%arg0: i32) -> (i32, i32) {
    %c0_i32 = arith.constant 0 : i32
    %c0_i32_0 = arith.constant 0 : i32
    return %c0_i32, %arg0 : i32, i32
  }
  func.func @transform_1(%arg0: i32) -> (i32, i32) {
    %c0_i32 = arith.constant 0 : i32
    %c0_i32_0 = arith.constant 0 : i32
    return %c0_i32, %arg0 : i32, i32
  }
  func.func @transform_2(%arg0: i32) -> (i32, i32) {
    %c0_i32 = arith.constant 0 : i32
    %c0_i32_0 = arith.constant 0 : i32
    return %c0_i32, %arg0 : i32, i32
  }
}

</mosaic_0001>

<bundles_post_ra>
// kernel: tpu_custom_call.1
= control target key start
LH: loop header
LB: loop body
LE: loop exit
PB: predicated region body
PF: predicated region fallthrough
CT: control target
= control target key end

     0   :  { %7 = vsyncpa [#allocation3], 0  ;;  %s205_s0 = inlined_call_operand.hbm [shape: f32[8,128], index: 0, kind: input, shape index: {}]   ;;  %s206_s1 = inlined_call_operand.hbm [shape: f32[8,128], index: 1, kind: input, shape index: {}]   ;;  %s207_s2 = inlined_call_operand.hbm [shape: s32[1,128], index: 2, kind: output, shape index: {}]  }
   0x1   :  { %8 = vsyncpa [#allocation6], 0 }
   0x2   :  { %9 = vsyncpa [#allocation4], 0  ;;  %s151_s9 = smov [#allocation2]   ;;  %s152_s11 = smov [#allocation5]  }
   0x3   :  { %s16_s10 = sshll.u32 %s151_s9, 4  ;;  %s26_s12 = sshll.u32 %s152_s11, 4  ;;  %s17_s10 = int_to_ptr.vmem [resolvable:$true] %s16_s10  ;;  %s27_s12 = int_to_ptr.vmem [resolvable:$true] %s26_s12 }
   0x4   :  { %s79_s15 = scalar_lea.hbm %s205_s0, 128 }
   0x5   :  { %p80_p0 = scmp.ne.s32.totalorder %s205_s0, %s79_s15  ;;  %p83_p1 = scmp.lt.u32.totalorder %s79_s15, %s205_s0 }
   0x7   :  { %p85_p2 = pnand %p83_p1, %p80_p0 }
   0x9   :  { %88 = shalt.err (!%p85_p2)
}
   0xa   :  { %s89_s20 = scalar_lea.vmem %s17_s10, 128  ;;  %p94_p4 = scmp.lt.s32.totalorder %s17_s10, %s17_s10 }
   0xb   :  { %p90_p3 = scmp.ne.s32.totalorder %s17_s10, %s89_s20  ;;  %p95_p5 = scmp.lt.s32.totalorder %s89_s20, %s89_s20 }
   0xd   :  { %p96_p6 = por %p95_p5, %p94_p4 }
   0xf   :  { %p97_p7 = pnand %p96_p6, %p90_p3 }
  0x11   :  { %100 = shalt.err (!%p97_p7)
}
  0x12   :  { %19 = dma.hbm_to_vmem [thread:$0]  %s205_s0, 128, %s17_s10, [#allocation3]  }
  0x13   :  { %s101_s25 = scalar_lea.hbm %s206_s1, 128 }
  0x14   :  { %p102_p8 = scmp.ne.s32.totalorder %s206_s1, %s101_s25  ;;  %p105_p9 = scmp.lt.u32.totalorder %s101_s25, %s206_s1 }
  0x16   :  { %p107_p10 = pnand %p105_p9, %p102_p8 }
  0x18   :  { %110 = shalt.err (!%p107_p10)
}
  0x19   :  { %s111_s30 = scalar_lea.vmem %s27_s12, 128  ;;  %p116_p12 = scmp.lt.s32.totalorder %s27_s12, %s27_s12 }
  0x1a   :  { %p112_p11 = scmp.ne.s32.totalorder %s27_s12, %s111_s30  ;;  %p117_p13 = scmp.lt.s32.totalorder %s111_s30, %s111_s30 }
  0x1c   :  { %p118_p0 = por %p117_p13, %p116_p12 }
  0x1e   :  { %p119_p1 = pnand %p118_p0, %p112_p11 }
  0x20   :  { %122 = shalt.err (!%p119_p1)
}
  0x21   :  { %29 = dma.hbm_to_vmem [thread:$0]  %s206_s1, 128, %s27_s12, [#allocation6]  }
  0x22   :  { %145 = dma.done.wait [#allocation3], 128  }
  0x23   :  { %146 = vsyncadd [#allocation3], 4294967168 }
  0x24   :  { %147 = dma.done.wait [#allocation6], 128  }
  0x25   :  { %148 = vsyncadd [#allocation6], 4294967168  ;;  %v36_v0 = vld [vmem:[#allocation2] sm:$0xff]  ;;  %v38_v1 = vld [vmem:[#allocation5] sm:$0xff]  ;;  %v46_v7 = vlaneseq  ;;  %s153_s1 = smov [#allocation7]  }
  0x26   :  { %v37_v2 = vmul.f32 7.0, %v36_v0  ;;  %s66_s4 = sshll.u32 %s153_s1, 4  ;;  %s67_s4 = int_to_ptr.vmem [resolvable:$true] %s66_s4 }
  0x27   :  { %v47_v10 = vshrl.u32 %v46_v7, 7  ;;  %s123_s5 = scalar_lea.vmem %s67_s4, 16  ;;  %s127_s6 = scalar_lea.vmem %s67_s4, 32 }
  0x28   :  { %v39_v3 = vadd.f32 %v38_v1, %v37_v2  ;;  %p124_p2 = scmp.ne.s32.totalorder %s67_s4, %s123_s5  ;;  %p128_p3 = scmp.lt.s32.totalorder %s67_s4, %s67_s4 }
  0x29   :  { %p129_p4 = scmp.lt.s32.totalorder %s127_s6, %s123_s5 }
  0x2a   :  { %v40_v4 = vrot.slane %v39_v3, 4 }
  0x2b   :  { %p130_p5 = por %p129_p4, %p128_p3 }
  0x2c   :  { %v41_v5 = vmax.f32 %v39_v3, %v40_v4 }
  0x2d   :  { %p131_p6 = pnand %p130_p5, %p124_p2 }
  0x2e   :  { %v42_v6 = vrot.slane %v41_v5, 2 }
  0x30   :  { %v43_v8 = vmax.f32 %v41_v5, %v42_v6 }
  0x32   :  { %v44_v9 = vrot.slane %v43_v8, 1 }
  0x34   :  { %v45_v11 = vmax.f32 %v43_v8, %v44_v9 }
  0x36   :  { %vm48_vm0 = vcmp.ge.f32.partialorder %v39_v3, %v45_v11 }
  0x37   :  { %v49_v12 = vsel %vm48_vm0, %v47_v10, 8 }
  0x38   :  { %v50_v13 = vrot.slane %v49_v12, 4 }
  0x3a   :  { %vm51_vm1 = vcmp.lt.s32.totalorder %v49_v12, %v50_v13 }
  0x3b   :  { %v52_v14 = vsel %vm51_vm1, %v49_v12, %v50_v13 }
  0x3c   :  { %v53_v15 = vrot.slane %v52_v14, 2 }
  0x3e   :  { %vm54_vm2 = vcmp.lt.s32.totalorder %v52_v14, %v53_v15 }
  0x3f   :  { %v55_v16 = vsel %vm54_vm2, %v52_v14, %v53_v15 }
  0x40   :  { %v56_v17 = vrot.slane %v55_v16, 1 }
  0x42   :  { %vm57_vm3 = vcmp.lt.s32.totalorder %v55_v16, %v56_v17 }
  0x43   :  { %v58_v18 = vsel %vm57_vm3, %v55_v16, %v56_v17 }
  0x44   :  { %59 = vst [vmem:[#allocation7] sm:$0x1] %v58_v18 }
  0x45   :  { %134 = shalt.err (!%p131_p6)
}
  0x46   :  { %s135_s9 = scalar_lea.hbm %s207_s2, 16 }
  0x47   :  { %p136_p7 = scmp.ne.s32.totalorder %s207_s2, %s135_s9  ;;  %p139_p8 = scmp.lt.u32.totalorder %s135_s9, %s207_s2 }
  0x49   :  { %p141_p9 = pnand %p139_p8, %p136_p7 }
  0x4b   :  { %144 = shalt.err (!%p141_p9)
}
  0x4c   :  { %69 = dma.vmem_to_hbm [thread:$0]  %s67_s4, 16, %s207_s2, [#allocation4]  }
  0x4d   :  { %149 = dma.done.wait [#allocation4], 16  }
  0x4e   :  { %150 = vsyncadd [#allocation4], 4294967280 }
  0x4f   :  { %73 = vsyncpa [#allocation3], 1 }
  0x50   :  { %74 = vsyncpa [#allocation6], 1 }
  0x51   :  { %75 = vsyncpa [#allocation4], 1 }

</bundles_post_ra>
